<compile_context>
chip_gen: v7x
topology: tpu7x:2x2x1
jax: 0.10.0
libtpu: 0.0.40
codegen_flags: <defaults>
</compile_context>

<pallas_src>
import jax
import jax.numpy as jnp
from jax import lax
from jax.experimental import pallas as pl
from jax.experimental.pallas import tpu as pltpu

# Module-consistent shapes: Conv2d(3, 3, 3) -> 3 in / 3 out channels, 3x3 kernel.
N, CIN, H, W = 2, 3, 16, 16
COUT, KH, KW = 3, 3, 3
OH, OW = H - KH + 1, W - KW + 1            # valid conv, stride 1 -> 14 x 14
K = CIN * KH * KW                          # 27 taps per output channel
KA = K + 1                                 # +1 ones-row folds the bias into the matmul
K_PAD = 32                                 # pad contraction dim (zero rows/cols)
CO_PAD = 8                                 # pad output channels to a full sublane group
P = N * OH * OW                            # 392 output positions per channel
PAD = ((P + 127) // 128) * 128             # 512 -> lane-dense (multiple of 128)


def conv_matmul_kernel(w_ref, p_ref, o_ref):
    """Single MXU matmul; bias is already folded into the weight tile.

    w_ref: (CO_PAD, K_PAD) f32 VMEM -- [conv weights | bias column | zero pad]
    p_ref: (K_PAD, PAD)    f32 VMEM -- [im2col patches ; ones row ; zero pad]
    o_ref: (CO_PAD, PAD)   f32 VMEM -- lane-dense output, one unmasked full-block store
    """
    o_ref[...] = jnp.dot(
        w_ref[...], p_ref[...],
        preferred_element_type=jnp.float32,
        precision=lax.Precision.HIGHEST,
    )


def conv2d_3x3(x, w, b):
    """x: (N, CIN, H, W) f32, w: (COUT, CIN, KH, KW) f32, b: (COUT,) f32."""
    # --- im2col on the raw 6 KiB input (layout plumbing, plain JAX) ----------
    xt = jnp.transpose(x, (1, 0, 2, 3))                       # (CIN, N, H, W)
    shifted = [xt[:, :, kh:kh + OH, kw:kw + OW]                # (CIN, N, OH, OW) each
               for kh in range(KH) for kw in range(KW)]
    pat = jnp.stack(shifted, axis=1)                           # (CIN, KH*KW, N, OH, OW)
    pat = pat.reshape(K, P)                                    # k = ci*9+kh*3+kw ; p = n*OH*OW+oh*OW+ow
    pat = jnp.pad(pat, ((0, 0), (0, PAD - P)))                 # lane-dense (K, 512)
    ones_row = jnp.ones((1, PAD), jnp.float32)                 # bias row
    zpad = jnp.zeros((K_PAD - KA, PAD), jnp.float32)
    pat = jnp.concatenate([pat.astype(jnp.float32), ones_row, zpad], axis=0)   # (K_PAD, PAD)

    # --- weight tile: [W | bias], zero-padded to (CO_PAD, K_PAD) --------------
    w2d = jnp.concatenate(
        [w.reshape(COUT, K), b.reshape(COUT, 1)], axis=1).astype(jnp.float32)  # (COUT, KA)
    w2d = jnp.pad(w2d, ((0, CO_PAD - COUT), (0, K_PAD - KA)))                  # (CO_PAD, K_PAD)

    cost = pl.CostEstimate(
        flops=2 * K * COUT * P,
        transcendentals=0,
        bytes_accessed=4 * (K_PAD * PAD + CO_PAD * K_PAD + CO_PAD * PAD),
    )

    # Single-tile kernel: at these shapes (~70 KiB VMEM, ~84 KFLOP) the problem is
    # pallas_call-overhead bound, so no grid is used (see scaling TODO at the top).
    y = pl.pallas_call(
        conv_matmul_kernel,
        out_shape=jax.ShapeDtypeStruct((CO_PAD, PAD), jnp.float32),
        in_specs=[
            pl.BlockSpec(memory_space=pltpu.MemorySpace.VMEM),   # weights+bias tile
            pl.BlockSpec(memory_space=pltpu.MemorySpace.VMEM),   # im2col patches
        ],
        out_specs=pl.BlockSpec(memory_space=pltpu.MemorySpace.VMEM),
        cost_estimate=cost,
    )(w2d, pat)

    # Back to NCHW (plain JAX slice/reshape/transpose of padded rows/lanes).
    return y[:COUT, :P].reshape(COUT, N, OH, OW).transpose(1, 0, 2, 3)


def example_backbone_forward(x, w, b):
    # Mirrors ExampleBackbone.forward: returns a list with the single conv output.
    return [conv2d_3x3(x, w, b)]


if __name__ == "__main__":
    key = jax.random.PRNGKey(0)
    kx, kw_key, kb = jax.random.split(key, 3)

    x = jax.random.normal(kx, (N, CIN, H, W), dtype=jnp.float32)

    # Deterministic params; match PyTorch Conv2d default init range U(-k, k), k = 1/sqrt(fan_in).
    fan_in = CIN * KH * KW
    bound = 1.0 / (fan_in ** 0.5)
    w = jax.random.uniform(kw_key, (COUT, CIN, KH, KW), jnp.float32, -bound, bound)
    b = jax.random.uniform(kb, (COUT,), jnp.float32, -bound, bound)

    outs = example_backbone_forward(x, w, b)
    out = jax.block_until_ready(outs[0])

    # Reference check against XLA's conv (f32 precision).
    ref = jax.lax.conv_general_dilated(
        x, w, window_strides=(1, 1), padding="VALID",
        dimension_numbers=("NCHW", "OIHW", "NCHW"),
        precision=jax.lax.Precision.HIGHEST,
    ) + b[None, :, None, None]

    assert out.shape == (N, COUT, OH, OW), out.shape
    assert out.dtype == jnp.float32
    assert jnp.allclose(out, ref, atol=1e-4, rtol=1e-4)

    print("KERNEL_OK")
</pallas_src>

<mosaic_0001>
module attributes {stable_mosaic.version = 11 : i64} {
  func.func @conv_matmul_kernel(%arg0: memref<8x32xf32, #tpu.memory_space<vmem>>, %arg1: memref<32x512xf32, #tpu.memory_space<vmem>>, %arg2: memref<8x512xf32, #tpu.memory_space<vmem>>) attributes {dimension_semantics = [], scalar_prefetch = 0 : i64, scratch_operands = 0 : i64, tpu.core_type = #tpu.core_type<tc>} {
    %c0 = arith.constant 0 : index
    %c0_0 = arith.constant 0 : index
    %0 = vector.load %arg0[%c0, %c0_0] : memref<8x32xf32, #tpu.memory_space<vmem>>, vector<8x32xf32>
    %c0_1 = arith.constant 0 : index
    %c0_2 = arith.constant 0 : index
    %1 = vector.load %arg1[%c0_1, %c0_2] : memref<32x512xf32, #tpu.memory_space<vmem>>, vector<32x512xf32>
    %cst = arith.constant dense<0.000000e+00> : vector<8x512xf32>
    %2 = tpu.matmul %0, %1, %cst {dimension_numbers = #tpu.dot_dimension_numbers<[1], [0], [0], [1], [0, 0, 1, 1], [], []>, precision = #tpu.contract_precision<fp32>} : vector<8x32xf32>, vector<32x512xf32>, vector<8x512xf32> -> vector<8x512xf32>
    %c0_3 = arith.constant 0 : index
    %c0_4 = arith.constant 0 : index
    %3 = vector.load %arg2[%c0_3, %c0_4] : memref<8x512xf32, #tpu.memory_space<vmem>>, vector<8x512xf32>
    tpu.vector_store %arg2[%c0_3, %c0_4], %2 {strides = array<i32>} : memref<8x512xf32, #tpu.memory_space<vmem>>, vector<8x512xf32>,
    return
  }
}

</mosaic_0001>

<bundles_post_ra>
// kernel: tpu_custom_call.1
= control target key start
LH: loop header
LB: loop body
LE: loop exit
PB: predicated region body
PF: predicated region fallthrough
CT: control target
= control target key end

     0   :  { %7 = vsyncpa [#allocation3], 0  ;;  %s1636_s0 = inlined_call_operand.hbm [shape: f32[8,32], index: 0, kind: input, shape index: {}]   ;;  %s1637_s1 = inlined_call_operand.hbm [shape: f32[32,512], index: 1, kind: input, shape index: {}]   ;;  %s1638_s2 = inlined_call_operand.hbm [shape: f32[8,512], index: 2, kind: output, shape index: {}]  }
   0x1   :  { %8 = vsyncpa [#allocation6], 0 }
   0x2   :  { %9 = vsyncpa [#allocation4], 0  ;;  %s1359_s9 = smov [#allocation2]   ;;  %s1360_s11 = smov [#allocation5]  }
   0x3   :  { %s16_s10 = sshll.u32 %s1359_s9, 4  ;;  %s25_s12 = sshll.u32 %s1360_s11, 4  ;;  %s17_s10 = int_to_ptr.vmem [resolvable:$true] %s16_s10  ;;  %s1380_s12 = int_to_ptr.vmem [resolvable:$true] %s25_s12 }
   0x4   :  { %s1287_s15 = scalar_lea.hbm %s1636_s0, 128 }
   0x5   :  { %p1288_p0 = scmp.ne.s32.totalorder %s1636_s0, %s1287_s15  ;;  %p1291_p1 = scmp.lt.u32.totalorder %s1287_s15, %s1636_s0 }
   0x7   :  { %p1293_p2 = pnand %p1291_p1, %p1288_p0 }
   0x9   :  { %1296 = shalt.err (!%p1293_p2)
}
   0xa   :  { %s1297_s20 = scalar_lea.vmem %s17_s10, 128  ;;  %p1302_p4 = scmp.lt.s32.totalorder %s17_s10, %s17_s10 }
   0xb   :  { %p1298_p3 = scmp.ne.s32.totalorder %s17_s10, %s1297_s20  ;;  %p1303_p5 = scmp.lt.s32.totalorder %s1297_s20, %s1297_s20 }
   0xd   :  { %p1304_p6 = por %p1303_p5, %p1302_p4 }
   0xf   :  { %p1305_p7 = pnand %p1304_p6, %p1298_p3 }
  0x11   :  { %1308 = shalt.err (!%p1305_p7)
}
  0x12   :  { %19 = dma.hbm_to_vmem [thread:$0]  %s1636_s0, 128, %s17_s10, [#allocation3]  }
  0x13   :  { %s1309_s25 = scalar_lea.hbm %s1637_s1, 2048 }
  0x14   :  { %p1310_p8 = scmp.ne.s32.totalorder %s1637_s1, %s1309_s25  ;;  %p1313_p9 = scmp.lt.u32.totalorder %s1309_s25, %s1637_s1 }
  0x16   :  { %p1315_p10 = pnand %p1313_p9, %p1310_p8 }
  0x18   :  { %1318 = shalt.err (!%p1315_p10)
}
  0x19   :  { %s1319_s30 = scalar_lea.vmem %s1380_s12, 2048  ;;  %p1324_p12 = scmp.lt.s32.totalorder %s1380_s12, %s1380_s12 }
  0x1a   :  { %p1320_p11 = scmp.ne.s32.totalorder %s1380_s12, %s1319_s30  ;;  %p1325_p13 = scmp.lt.s32.totalorder %s1319_s30, %s1319_s30 }
  0x1c   :  { %p1326_p0 = por %p1325_p13, %p1324_p12 }
  0x1e   :  { %p1327_p1 = pnand %p1326_p0, %p1320_p11 }
  0x20   :  { %1330 = shalt.err (!%p1327_p1)
}
  0x21   :  { %s1361_s0 = smov 512   ;;  %s1362_s3 = smov 32  }
  0x22   :  { %31 = dma.hbm_to_vmem [thread:$0]  %s1637_s1, 2048, %s1380_s12, [#allocation6], %s1361_s0, %s1361_s0, %s1362_s3  }
  0x23   :  { %1353 = dma.done.wait [#allocation3], 128  }
  0x24   :  { %1354 = vsyncadd [#allocation3], 4294967168 }
  0x25   :  { %1355 = dma.done.wait [#allocation6], 2048  }
  0x26   :  { %1356 = vsyncadd [#allocation6], 4294965248  ;;  %v1363_v0 = vmov 0.0   ;;  %v40_v1 = vld [vmem:[#allocation5 + $0x8] sm:$0xff]  ;;  %v42_v3 = vld [vmem:[#allocation5 + $0x18] sm:$0xff]  ;;  %vm55_vm0 = vcmask 261120  }
  0x27   :  { %131 = vmatprep.mubr.f32.mxu0 %v1363_v0  ;;  %674 = vmatprep.mubr.f32.mxu1 %v1363_v0  ;;  %v44_v2 = vld [vmem:[#allocation5 + $0x28] sm:$0xff]  ;;  %v59_v4 = vand.u32 4294901760, %v40_v1  ;;  %v46_v6 = vld [vmem:[#allocation5 + $0x38] sm:$0xff]  ;;  %v602_v7 = vand.u32 4294901760, %v42_v3  ;;  %v39_v8 = vld [vmem:[#allocation5] sm:$0xff]  ;;  %s1364_s1 = smov [#allocation7]  }
  0x28   :  { %v63_v5 = vand.u32 4294901760, %v44_v2  ;;  %v43_v9 = vld [vmem:[#allocation5 + $0x20] sm:$0xff]  ;;  %v606_v10 = vand.u32 4294901760, %v46_v6  ;;  %v61_v11 = vand.u32 4294901760, %v39_v8  ;;  %v41_v13 = vld [vmem:[#allocation5 + $0x10] sm:$0xff]  ;;  %v48_v15 = vld [vmem:[#allocation5 + $0x48] sm:$0xff] }
  0x29   :  { %v65_v12 = vand.u32 4294901760, %v43_v9  ;;  %v45_v14 = vld [vmem:[#allocation5 + $0x30] sm:$0xff]  ;;  %v1415_v17 = vsub.f32 %v40_v1, %v59_v4  ;;  %v1419_v19 = vsub.f32 %v42_v3, %v602_v7  ;;  %v52_v20 = vld [vmem:[#allocation5 + $0x68] sm:$0xff]  ;;  %v50_v21 = vld [vmem:[#allocation5 + $0x58] sm:$0xff]  ;;  %v604_v29 = vand.u32 4294901760, %v41_v13  ;;  %s1155_s6 = sshll.u32 %s1364_s1, 4  ;;  %s1156_s6 = int_to_ptr.vmem [resolvable:$true] %s1155_s6 }
  0x2a   :  { %v1413_v16 = vpack.c.bf16 %v63_v5, %v59_v4  ;;  %v1417_v18 = vsub.f32 %v44_v2, %v63_v5  ;;  %v54_v22 = vld [vmem:[#allocation5 + $0x78] sm:$0xff]  ;;  %v1421_v23 = vpack.c.bf16 %v606_v10, %v602_v7  ;;  %v1423_v24 = vsub.f32 %v46_v6, %v606_v10  ;;  %v47_v27 = vld [vmem:[#allocation5 + $0x40] sm:$0xff]  ;;  %v49_v37 = vld [vmem:[#allocation5 + $0x50] sm:$0xff]  ;;  %s1331_s7 = scalar_lea.vmem %s1156_s6, 512  ;;  %p1336_p3 = scmp.lt.s32.totalorder %s1156_s6, %s1156_s6 }
  0x2b   :  { %v1425_v25 = vpack.c.bf16 %v65_v12, %v61_v11  ;;  %v1427_v26 = vsub.f32 %v39_v8, %v61_v11  ;;  %v1430_v28 = vsub.f32 %v43_v9, %v65_v12  ;;  %v608_v30 = vand.u32 4294901760, %v45_v14  ;;  %v51_v35 = vld [vmem:[#allocation5 + $0x60] sm:$0xff]  ;;  %v53_v42 = vld [vmem:[#allocation5 + $0x70] sm:$0xff]  ;;  %v38_v43 = vld [vmem:[#allocation2] sm:$0xff]  ;;  %p1332_p2 = scmp.ne.s32.totalorder %s1156_s6, %s1331_s7  ;;  %p1337_p4 = scmp.lt.s32.totalorder %s1331_s7, %s1331_s7 }
  0x2c   :  { %1166 = vmatprep.subr.bf16.mxu0 %v1413_v16  ;;  %v67_v31 = vand.u32 4294901760, %v48_v15  ;;  %1214 = vmatprep.subr.bf16.mxu1 %v1421_v23  ;;  %v71_v32 = vand.u32 4294901760, %v52_v20  ;;  %v610_v33 = vand.u32 4294901760, %v50_v21  ;;  %v614_v34 = vand.u32 4294901760, %v54_v22 }
  0x2d   :  { %1168 = vmatpush1.bf16.msra.mxu0 %v1425_v25  ;;  %v69_v36 = vand.u32 4294901760, %v47_v27  ;;  %v1434_v38 = vpack.c.bf16 %v608_v30, %v604_v29  ;;  %v1436_v39 = vsub.f32 %v41_v13, %v604_v29  ;;  %v1438_v40 = vsub.f32 %v45_v14, %v608_v30  ;;  %p1338_p5 = por %p1337_p4, %p1336_p3 }
  0x2e   :  { %v1440_v41 = vsub.f32 %v48_v15, %v67_v31  ;;  %v1442_v44 = vpack.c.bf16 %v71_v32, %v67_v31  ;;  %v1444_v45 = vsub.f32 %v52_v20, %v71_v32  ;;  %v1446_v46 = vpack.c.bf16 %v614_v34, %v610_v33 }
  0x2f   :  { %v1448_v47 = vsub.f32 %v50_v21, %v610_v33  ;;  %1216 = vmatpush1.bf16.msra.mxu1 %v1434_v38  ;;  %v1451_v48 = vsub.f32 %v54_v22, %v614_v34  ;;  %v73_v49 = vand.u32 4294901760, %v51_v35  ;;  %v1453_v50 = vsub.f32 %v47_v27, %v69_v36  ;;  %p1339_p6 = pnand %p1338_p5, %p1332_p2 }
  0x30   :  { %v612_v51 = vand.u32 4294901760, %v49_v37  ;;  %1170 = vmatprep.subr.bf16.mxu0 %v1442_v44  ;;  %1218 = vmatprep.subr.bf16.mxu1 %v1446_v46  ;;  %v616_v52 = vand.u32 4294901760, %v53_v42  ;;  %v57_v53 = vsel %vm55_vm0, %v38_v43, 0  ;;  %v145_v54 = vand.u32 4294901760, %v1415_v17 }
  0x31   :  { %v157_v55 = vand.u32 4294901760, %v1417_v18  ;;  %v1460_v56 = vpack.c.bf16 %v73_v49, %v69_v36  ;;  %v1462_v57 = vsub.f32 %v51_v35, %v73_v49  ;;  %v1466_v59 = vand.u32 4294901760, %v57_v53 }
  0x32   :  { %v1464_v58 = vsub.f32 %v49_v37, %v612_v51  ;;  %v1468_v60 = vpack.c.bf16 %v616_v52, %v612_v51  ;;  %v1470_v61 = vsub.f32 %v53_v42, %v616_v52  ;;  %v146_v62 = vsub.f32 %v1415_v17, %v145_v54 }
  0x33   :  { %v158_v63 = vsub.f32 %v1417_v18, %v157_v55  ;;  %1172 = vmatpush1.bf16.msra.mxu0 %v1460_v56  ;;  %v1480_v1 = vsub.f32 %v57_v53, %v1466_v59  ;;  %v688_v2 = vand.u32 4294901760, %v1419_v19  ;;  %v700_v3 = vand.u32 4294901760, %v1423_v24 }
  0x34   :  { %v151_v4 = vand.u32 4294901760, %v1427_v26  ;;  %1220 = vmatpush1.bf16.msra.mxu1 %v1468_v60  ;;  %v147_v5 = vand.u32 4294901760, %v146_v62  ;;  %v163_v7 = vand.u32 4294901760, %v1430_v28  ;;  %v694_v8 = vand.u32 4294901760, %v1436_v39 }
  0x35   :  { %v159_v6 = vand.u32 4294901760, %v158_v63  ;;  %v1489_v9 = vand.u32 4294901760, %v1480_v1  ;;  %v689_v10 = vsub.f32 %v1419_v19, %v688_v2  ;;  %v701_v11 = vsub.f32 %v1423_v24, %v700_v3 }
  0x36   :  { %v152_v12 = vsub.f32 %v1427_v26, %v151_v4  ;;  %v164_v14 = vsub.f32 %v1430_v28, %v163_v7  ;;  %v695_v15 = vsub.f32 %v1436_v39, %v694_v8  ;;  %v706_v20 = vand.u32 4294901760, %v1438_v40 }
  0x37   :  { %v1173_v13 = vpack.c.bf16 %v159_v6, %v147_v5  ;;  %v135_v21 = vsub.f32 %v1480_v1, %v1489_v9  ;;  %v690_v22 = vand.u32 4294901760, %v689_v10  ;;  %v702_v27 = vand.u32 4294901760, %v701_v11 }
  0x38   :  { %v153_v29 = vand.u32 4294901760, %v152_v12  ;;  %v165_v30 = vand.u32 4294901760, %v164_v14  ;;  %v696_v31 = vand.u32 4294901760, %v695_v15  ;;  %v707_v32 = vsub.f32 %v1438_v40, %v706_v20 }
  0x39   :  { %1174 = vmatprep.subr.bf16.mxu0 %v1173_v13  ;;  %v169_v33 = vand.u32 4294901760, %v1440_v41  ;;  %v136_v34 = vand.u32 4294901760, %v135_v21  ;;  %v1221_v35 = vpack.c.bf16 %v702_v27, %v690_v22  ;;  %v181_v36 = vand.u32 4294901760, %v1444_v45 }
  0x3a   :  { %v712_v37 = vand.u32 4294901760, %v1448_v47  ;;  %v1175_v42 = vpack.c.bf16 %v165_v30, %v153_v29  ;;  %v708_v43 = vand.u32 4294901760, %v707_v32  ;;  %v724_v51 = vand.u32 4294901760, %v1451_v48 }
  0x3b   :  { %v170_v49 = vsub.f32 %v1440_v41, %v169_v33  ;;  %137 = vmatmul.mubr.f32.vlgmr.msra.gmra.mrb[0].mxu0 %v136_v34  ;;  %680 = vmatmul.mubr.f32.vlgmr.msra.gmra.mrb[0].mxu1 %v136_v34  ;;  %v182_v52 = vsub.f32 %v1444_v45, %v181_v36  ;;  %v175_v62 = vand.u32 4294901760, %v1453_v50  ;;  %v187_v63 = vand.u32 4294901760, %v1462_v57 }
  0x3c   :  { %v713_v53 = vsub.f32 %v1448_v47, %v712_v37  ;;  %1222 = vmatprep.subr.bf16.mxu1 %v1221_v35  ;;  %1176 = vmatpush1.bf16.msra.mxu0 %v1175_v42  ;;  %v1223_v5 = vpack.c.bf16 %v708_v43, %v696_v31  ;;  %v725_v10 = vsub.f32 %v1451_v48, %v724_v51  ;;  %v718_v11 = vand.u32 4294901760, %v1464_v58 }
  0x3d   :  { %v171_v6 = vand.u32 4294901760, %v170_v49  ;;  %v183_v12 = vand.u32 4294901760, %v182_v52  ;;  %v176_v14 = vsub.f32 %v1453_v50, %v175_v62  ;;  %v188_v15 = vsub.f32 %v1462_v57, %v187_v63  ;;  %247 = vmatprep.mubr.f32.mxu0 %v1363_v0  ;;  %790 = vmatprep.mubr.f32.mxu1 %v1363_v0 }
  0x3e   :  { %v714_v13 = vand.u32 4294901760, %v713_v53  ;;  %1224 = vmatpush1.bf16.msra.mxu1 %v1223_v5  ;;  %v726_v21 = vand.u32 4294901760, %v725_v10  ;;  %v719_v22 = vsub.f32 %v1464_v58, %v718_v11  ;;  %v730_v27 = vand.u32 4294901760, %v1470_v61 }
  0x3f   :  { %v1177_v29 = vpack.c.bf16 %v183_v12, %v171_v6  ;;  %v177_v30 = vand.u32 4294901760, %v176_v14  ;;  %v189_v31 = vand.u32 4294901760, %v188_v15  ;;  %v1181_v42 = vpack.c.bf16 %v1417_v18, %v1415_v17 }
  0x40   :  { %v1225_v32 = vpack.c.bf16 %v726_v21, %v714_v13  ;;  %v720_v34 = vand.u32 4294901760, %v719_v22  ;;  %v731_v35 = vsub.f32 %v1470_v61, %v730_v27  ;;  %v1229_v52 = vpack.c.bf16 %v1423_v24, %v1419_v19 }
  0x41   :  { %1178 = vmatprep.subr.bf16.mxu0 %v1177_v29  ;;  %v1179_v43 = vpack.c.bf16 %v189_v31, %v177_v30  ;;  %v1183_v53 = vpack.c.bf16 %v1430_v28, %v1427_v26  ;;  %v1185_v6 = vpack.c.bf16 %v1444_v45, %v1440_v41  ;;  %v1231_v10 = vpack.c.bf16 %v1438_v40, %v1436_v39 }
  0x42   :  { %1226 = vmatprep.subr.bf16.mxu1 %v1225_v32  ;;  %v732_v49 = vand.u32 4294901760, %v731_v35  ;;  %v1233_v12 = vpack.c.bf16 %v1451_v48, %v1448_v47  ;;  %v1187_v13 = vpack.c.bf16 %v1462_v57, %v1453_v50  ;;  %v1235_v14 = vpack.c.bf16 %v1470_v61, %v1464_v58 }
  0x43   :  { %1180 = vmatpush1.bf16.msra.mxu0 %v1179_v43  ;;  %v1197_v61 = vpack.c.bf16 %v157_v55, %v145_v54  ;;  %v1245_v15 = vpack.c.bf16 %v700_v3, %v688_v2  ;;  %v1199_v17 = vpack.c.bf16 %v163_v7, %v151_v4  ;;  %v1201_v18 = vpack.c.bf16 %v181_v36, %v169_v33 }
  0x44   :  { %v1227_v5 = vpack.c.bf16 %v732_v49, %v720_v34  ;;  %1182 = vmatprep.subr.bf16.mxu0 %v1181_v42  ;;  %v1247_v19 = vpack.c.bf16 %v706_v20, %v694_v8  ;;  %v1249_v24 = vpack.c.bf16 %v724_v51, %v712_v37  ;;  %v1203_v26 = vpack.c.bf16 %v187_v63, %v175_v62 }
  0x45   :  { %v1251_v28 = vpack.c.bf16 %v730_v27, %v718_v11 }
  0x46   :  { %1228 = vmatpush1.bf16.msra.mxu1 %v1227_v5  ;;  %249 = vmatmul.mubr.f32.vlgmr.msra.gmra.mrb[0].mxu0 %v1466_v59 }
  0x47   :  { %1230 = vmatprep.subr.bf16.mxu1 %v1229_v52  ;;  %1184 = vmatpush1.bf16.msra.mxu0 %v1183_v53 }
  0x48   :  { %1186 = vmatprep.subr.bf16.mxu0 %v1185_v6  ;;  %335 = vmatprep.mubr.f32.mxu0 %v1363_v0 }
  0x49   :  { %792 = vmatmul.mubr.f32.vlgmr.msra.gmra.mrb[0].mxu1 %v1466_v59 }
  0x4a   :  { %1232 = vmatpush1.bf16.msra.mxu1 %v1231_v10  ;;  %878 = vmatprep.mubr.f32.mxu1 %v1363_v0 }
  0x4b   :  { %1234 = vmatprep.subr.bf16.mxu1 %v1233_v12  ;;  %1188 = vmatpush1.bf16.msra.mxu0 %v1187_v13 }
  0x4c   :  { %1190 = vmatprep.subr.bf16.mxu0 %v1413_v16 }
  0x4e   :  { %1236 = vmatpush1.bf16.msra.mxu1 %v1235_v14  ;;  %338 = vmatmul.mubr.f32.vlgmr.msra.gmra.mrb[0].mxu0 %v1480_v1 }
  0x4f   :  { %1238 = vmatprep.subr.bf16.mxu1 %v1421_v23  ;;  %1192 = vmatpush1.bf16.msra.mxu0 %v1425_v25 }
  0x50   :  { %1194 = vmatprep.subr.bf16.mxu0 %v1442_v44  ;;  %416 = vmatprep.mubr.f32.mxu0 %v1363_v0 }
  0x51   :  { %881 = vmatmul.mubr.f32.vlgmr.msra.gmra.mrb[0].mxu1 %v1480_v1 }
  0x52   :  { %1240 = vmatpush1.bf16.msra.mxu1 %v1434_v38  ;;  %959 = vmatprep.mubr.f32.mxu1 %v1363_v0 }
  0x53   :  { %1242 = vmatprep.subr.bf16.mxu1 %v1446_v46  ;;  %1196 = vmatpush1.bf16.msra.mxu0 %v1460_v56 }
  0x54   :  { %1198 = vmatprep.subr.bf16.mxu0 %v1197_v61 }
  0x56   :  { %1244 = vmatpush1.bf16.msra.mxu1 %v1468_v60  ;;  %420 = vmatmul.mubr.f32.vlgmr.msra.gmra.mrb[0].mxu0 %v1489_v9 }
  0x57   :  { %1246 = vmatprep.subr.bf16.mxu1 %v1245_v15  ;;  %1200 = vmatpush1.bf16.msra.mxu0 %v1199_v17 }
  0x58   :  { %1202 = vmatprep.subr.bf16.mxu0 %v1201_v18  ;;  %514 = vmatprep.mubr.f32.mxu0 %v1363_v0 }
  0x59   :  { %963 = vmatmul.mubr.f32.vlgmr.msra.gmra.mrb[0].mxu1 %v1489_v9 }
  0x5a   :  { %1248 = vmatpush1.bf16.msra.mxu1 %v1247_v19  ;;  %1057 = vmatprep.mubr.f32.mxu1 %v1363_v0 }
  0x5b   :  { %1250 = vmatprep.subr.bf16.mxu1 %v1249_v24  ;;  %1204 = vmatpush1.bf16.msra.mxu0 %v1203_v26 }
  0x5c   :  { %1206 = vmatprep.subr.bf16.mxu0 %v1413_v16 }
  0x5e   :  { %1252 = vmatpush1.bf16.msra.mxu1 %v1251_v28  ;;  %516 = vmatmul.mubr.f32.vlgmr.msra.gmra.mrb[0].mxu0 %v1466_v59 }
  0x5f   :  { %1254 = vmatprep.subr.bf16.mxu1 %v1421_v23  ;;  %1208 = vmatpush1.bf16.msra.mxu0 %v1425_v25 }
  0x60   :  { %1210 = vmatprep.subr.bf16.mxu0 %v1442_v44  ;;  %594 = vmatprep.mubr.f32.mxu0 %v1363_v0 }
  0x61   :  { %1059 = vmatmul.mubr.f32.vlgmr.msra.gmra.mrb[0].mxu1 %v1466_v59 }
  0x62   :  { %1256 = vmatpush1.bf16.msra.mxu1 %v1434_v38  ;;  %1137 = vmatprep.mubr.f32.mxu1 %v1363_v0 }
  0x63   :  { %1258 = vmatprep.subr.bf16.mxu1 %v1446_v46  ;;  %1212 = vmatpush1.bf16.msra.mxu0 %v1460_v56 }
  0x66   :  { %1260 = vmatpush1.bf16.msra.mxu1 %v1468_v60  ;;  %596 = vmatmul.mubr.f32.vlgmr.msra.gmra.mrb[0].mxu0 %v1466_v59 }
  0x69   :  { %1139 = vmatmul.mubr.f32.vlgmr.msra.gmra.mrb[0].mxu1 %v1466_v59 }
 0x139   :  { %v597_v16 = vpop.f32.mrb[0].mxu0 }
 0x13a   :  { %1145 = vst [vmem:[#allocation7] sm:$0xff] %v597_v16  ;;  %v599_v23 = vpop.f32.mrb[1].mxu0 }
 0x13b   :  { %1146 = vst [vmem:[#allocation7 + $0x8] sm:$0xff] %v599_v23 }
 0x13c   :  { %v1140_v25 = vpop.f32.mrb[0].mxu1 }
 0x13d   :  { %1147 = vst [vmem:[#allocation7 + $0x10] sm:$0xff] %v1140_v25  ;;  %v1142_v0 = vpop.f32.mrb[1].mxu1 }
 0x13e   :  { %1148 = vst [vmem:[#allocation7 + $0x18] sm:$0xff] %v1142_v0 }
 0x13f   :  { %1342 = shalt.err (!%p1339_p6)
}
 0x140   :  { %s1343_s10 = scalar_lea.hbm %s1638_s2, 512 }
 0x141   :  { %p1344_p7 = scmp.ne.s32.totalorder %s1638_s2, %s1343_s10  ;;  %p1347_p8 = scmp.lt.u32.totalorder %s1343_s10, %s1638_s2 }
 0x143   :  { %p1349_p9 = pnand %p1347_p8, %p1344_p7 }
 0x145   :  { %1352 = shalt.err (!%p1349_p9)
}
 0x146   :  { %1158 = dma.vmem_to_hbm [thread:$0]  %s1156_s6, 512, %s1638_s2, [#allocation4]  }
 0x147   :  { %1357 = dma.done.wait [#allocation4], 512  }
 0x148   :  { %1358 = vsyncadd [#allocation4], 4294966784 }
 0x149   :  { %1162 = vsyncpa [#allocation3], 1 }
 0x14a   :  { %1163 = vsyncpa [#allocation6], 1 }
 0x14b   :  { %1164 = vsyncpa [#allocation4], 1 }

</bundles_post_ra>
